<compile_context>
chip_gen: v7x
topology: tpu7x:2x2x1
jax: 0.10.0
libtpu: 0.0.40
codegen_flags: <defaults>
</compile_context>

<pallas_src>
import jax
import jax.numpy as jnp
from jax import lax
from jax.experimental import pallas as pl
from jax.experimental.pallas import tpu as pltpu


_CHUNK = 512        # in-kernel sub-chunk (lanes); tile_b is a multiple of this
_TILE_CAP = 16384   # default per-step lane-tile cap (fits v5e/v6e/v7x VMEM)


# ---------------------------------------------------------------------------
# Packed parameter slab layout (f32, shape (64, 32)), sigmoid affine folded in:
#   rows  0:24, cols 0:6   W1' = 0.5*W1            rows  0:24, col 6   b1' = 0.5*b1
#   rows 24:42, cols 0:24  W2' = 0.25*W2           rows 24:42, col 24  b2' = 0.25*rowsum(W2)+0.5*b2
#   rows 48:60, cols 0:18  W3' = 0.5*W3            rows 48:60, col 18  b3' = 0.5*rowsum(W3)+b3
#   rows 48:60, col 19     w4 stored as a column (12,)
#   row  48,    col 20     b4 (scalar)
# Row starts (0, 24, 48) are multiples of 8 so sublane slices stay aligned.
# Kernel math (exactly equivalent to the PyTorch forward):
#   t1 = tanh(W1'.x + b1')          == 2*sigmoid(W1.x + b1) - 1
#   t2 = tanh(W2'.t1 + b2')         == 2*sigmoid(W2.s1 + b2) - 1
#   h3 = relu(W3'.t2 + b3')         == relu(W3.s2 + b3)
#   y  = w4.h3 + b4
# ---------------------------------------------------------------------------
def pack_params(params):
    w1, b1, w2, b2, w3, b3, w4, b4 = [jnp.asarray(p, jnp.float32) for p in params]
    w1p, b1p = 0.5 * w1, 0.5 * b1
    w2p, b2p = 0.25 * w2, 0.25 * jnp.sum(w2, axis=1) + 0.5 * b2
    w3p, b3p = 0.5 * w3, 0.5 * jnp.sum(w3, axis=1) + b3

    slab = jnp.zeros((64, 32), jnp.float32)
    slab = slab.at[0:24, 0:6].set(w1p)
    slab = slab.at[0:24, 6].set(b1p)
    slab = slab.at[24:42, 0:24].set(w2p)
    slab = slab.at[24:42, 24].set(b2p)
    slab = slab.at[48:60, 0:18].set(w3p)
    slab = slab.at[48:60, 18].set(b3p)
    slab = slab.at[48:60, 19].set(w4[0, :])   # (1,12) weight row stored as a column
    slab = slab.at[48, 20].set(b4[0])
    return slab


def mlp_kernel(x_ref, p_ref, o_ref):
    # Resident weight views (static slices of the VMEM slab -> zero cost).
    w1 = p_ref[0:24, 0:6]
    b1 = p_ref[0:24, 6:7]
    w2 = p_ref[24:42, 0:24]
    b2 = p_ref[24:42, 24:25]
    w3 = p_ref[48:60, 0:18]
    b3 = p_ref[48:60, 18:19]
    w4 = p_ref[48:60, 19:20]                  # (12, 1)
    b4 = p_ref[48:49, 20:21]                  # (1, 1)

    tile_b = x_ref.shape[1]
    n_chunks = tile_b // _CHUNK               # static (tile_b is a trace-time int)

    def body(j, carry):
        off = pl.multiple_of(j * _CHUNK, _CHUNK)
        x = x_ref[:, pl.ds(off, _CHUNK)]                                   # (6, 512)

        # Layer 1+2: sigmoid folded into the packed weights -> plain tanh (EUP).
        t1 = jnp.tanh(jnp.dot(w1, x, preferred_element_type=jnp.float32) + b1)
        t2 = jnp.tanh(jnp.dot(w2, t1, preferred_element_type=jnp.float32) + b2)
        # Layer 3: ReLU.
        h3 = jnp.maximum(
            jnp.dot(w3, t2, preferred_element_type=jnp.float32) + b3, 0.0)  # (12, 512)
        # Layer 4 (12 -> 1) on VPU + XLU: broadcast-mul + sublane reduce.
        out = jnp.sum(h3 * w4, axis=0, keepdims=True) + b4                  # (1, 512)

        o_ref[:, pl.ds(off, _CHUNK)] = out.astype(o_ref.dtype)
        return carry

    if n_chunks <= 8:
        unroll = n_chunks                      # fully unroll short loops
    else:
        unroll = next(d for d in (8, 4, 2, 1) if n_chunks % d == 0)
    lax.fori_loop(0, n_chunks, body, 0, unroll=unroll)


def _round_up(n, m):
    return m * pl.cdiv(n, m)


def _choose_tile_b(batch):
    """Lane tile: multiple of _CHUNK, capped for VMEM, >=2 grid steps when possible."""
    b_ceil = _round_up(batch, _CHUNK)
    if b_ceil <= _CHUNK:
        return _CHUNK
    # Split into at least two steps so v7x's second TensorCore gets work.
    half = _round_up(pl.cdiv(batch, 2), _CHUNK)
    return min(_TILE_CAP, half)


def _mlp_pallas(xt, slab, tile_b):
    """xt: (6, b_pad) features-major, b_pad a multiple of tile_b -> (1, b_pad)."""
    b_pad = xt.shape[1]
    return pl.pallas_call(
        mlp_kernel,
        out_shape=jax.ShapeDtypeStruct((1, b_pad), jnp.float32),
        grid=(b_pad // tile_b,),
        in_specs=[
            pl.BlockSpec((6, tile_b), lambda i: (0, i)),       # streamed x tiles
            pl.BlockSpec((64, 32), lambda i: (0, 0)),          # resident weights
        ],
        out_specs=pl.BlockSpec((1, tile_b), lambda i: (0, i)),  # lane-dense out
        compiler_params=pltpu.CompilerParams(
            dimension_semantics=("parallel",)),                 # megacore split
    )(xt, slab)


def mlp_forward_features_major(xt, params, *, tile_b=None):
    """xt: (6, B) f32 (features-major, no wrapper transpose) -> (1, B) f32."""
    B = xt.shape[1]
    if tile_b is None:
        tile_b = _choose_tile_b(B)
    else:
        tile_b = max(_CHUNK, _round_up(int(tile_b), _CHUNK))    # round/clamp caller value
    b_pad = _round_up(B, tile_b)
    if b_pad != B:
        xt = jnp.zeros((6, b_pad), jnp.float32).at[:, :B].set(xt.astype(jnp.float32))
    else:
        xt = xt.astype(jnp.float32)
    out_t = _mlp_pallas(xt, pack_params(params), tile_b)
    return out_t[:, :B]


def mlp_forward(x, params, *, tile_b=None):
    """x: (B, 6) f32 -> (B, 1) f32. Weights are (out, in); biases are (out,).

    NOTE: the (B,6)->(6,B) transpose + pad below is a separate XLA pre-pass over
    x (a full extra HBM read+write).  Producers that can emit activations
    features-major should call mlp_forward_features_major directly.
    """
    B = x.shape[0]
    out_t = mlp_forward_features_major(x.astype(jnp.float32).T, params, tile_b=tile_b)
    return out_t.T.reshape(B, 1)


def init_params(key):
    # Deterministic init mimicking nn.Linear default (uniform +/- 1/sqrt(fan_in)).
    # Weights stored PyTorch-style as (out_features, in_features).
    dims = [(6, 24), (24, 18), (18, 12), (12, 1)]
    params = []
    for i, (fan_in, fan_out) in enumerate(dims):
        kw, kb = jax.random.split(jax.random.fold_in(key, i))
        bound = 1.0 / (fan_in ** 0.5)
        w = jax.random.uniform(kw, (fan_out, fan_in), jnp.float32, -bound, bound)
        b = jax.random.uniform(kb, (fan_out,), jnp.float32, -bound, bound)
        params.extend([w, b])
    return tuple(params)


def mlp_reference(x, params):
    w1, b1, w2, b2, w3, b3, w4, b4 = params
    h = jax.nn.sigmoid(x @ w1.T + b1)
    h = jax.nn.sigmoid(h @ w2.T + b2)
    h = jnp.maximum(h @ w3.T + b3, 0.0)
    return h @ w4.T + b4


if __name__ == "__main__":
    key = jax.random.PRNGKey(0)
    k_x, k_p = jax.random.split(key)
    params = init_params(k_p)

    # Small-batch check (single grid step, single sub-chunk, heavy padding).
    B = 8
    x = jax.random.normal(k_x, (B, 6), jnp.float32)
    out = jax.block_until_ready(mlp_forward(x, params))
    ref = mlp_reference(x, params)
    assert out.shape == (B, 1)
    assert jnp.allclose(out, ref, atol=1e-4, rtol=1e-4)

    # Multi-tile check (default tile selection -> 2 grid steps + batch padding).
    B2 = 600
    x2 = jax.random.normal(jax.random.fold_in(k_x, 1), (B2, 6), jnp.float32)
    out2 = jax.block_until_ready(mlp_forward(x2, params))
    ref2 = mlp_reference(x2, params)
    assert out2.shape == (B2, 1)
    assert jnp.allclose(out2, ref2, atol=1e-4, rtol=1e-4)

    # Caller-supplied non-multiple-of-512 tile_b is rounded/clamped internally.
    B3 = 1500
    x3 = jax.random.normal(jax.random.fold_in(k_x, 2), (B3, 6), jnp.float32)
    out3 = jax.block_until_ready(mlp_forward(x3, params, tile_b=200))
    ref3 = mlp_reference(x3, params)
    assert out3.shape == (B3, 1)
    assert jnp.allclose(out3, ref3, atol=1e-4, rtol=1e-4)

    # Features-major entry point (no wrapper transpose).
    out4 = jax.block_until_ready(mlp_forward_features_major(x2.T, params))
    assert out4.shape == (1, B2)
    assert jnp.allclose(out4.T, ref2, atol=1e-4, rtol=1e-4)

    print("KERNEL_OK")
</pallas_src>

<mosaic_0001>
module attributes {stable_mosaic.version = 11 : i64} {
  func.func @mlp_kernel(%arg0: i32, %arg1: memref<6x512xf32, #tpu.memory_space<vmem>>, %arg2: memref<64x32xf32, #tpu.memory_space<vmem>>, %arg3: memref<1x512xf32, #tpu.memory_space<vmem>>) attributes {dimension_semantics = [#tpu.dimension_semantics<parallel>], iteration_bounds = array<i64: 1>, scalar_prefetch = 0 : i64, scratch_operands = 0 : i64, tpu.core_type = #tpu.core_type<tc>, window_params = [{transform_indices = @transform_0, window_bounds = array<i64: 6, 512>}, {pipeline_mode = #tpu.pipeline_mode<synchronous>, transform_indices = @transform_1, window_bounds = array<i64: 64, 32>}, {transform_indices = @transform_2, window_bounds = array<i64: 1, 512>}]} {
    %c0 = arith.constant 0 : index
    %c0_0 = arith.constant 0 : index
    %0 = vector.load %arg2[%c0, %c0_0] : memref<64x32xf32, #tpu.memory_space<vmem>>, vector<24x6xf32>
    %c0_1 = arith.constant 0 : index
    %c6 = arith.constant 6 : index
    %1 = vector.load %arg2[%c0_1, %c6] : memref<64x32xf32, #tpu.memory_space<vmem>>, vector<24x1xf32>
    %c24 = arith.constant 24 : index
    %c0_2 = arith.constant 0 : index
    %2 = vector.load %arg2[%c24, %c0_2] : memref<64x32xf32, #tpu.memory_space<vmem>>, vector<18x24xf32>
    %c24_3 = arith.constant 24 : index
    %c24_4 = arith.constant 24 : index
    %3 = vector.load %arg2[%c24_3, %c24_4] : memref<64x32xf32, #tpu.memory_space<vmem>>, vector<18x1xf32>
    %c48 = arith.constant 48 : index
    %c0_5 = arith.constant 0 : index
    %4 = vector.load %arg2[%c48, %c0_5] : memref<64x32xf32, #tpu.memory_space<vmem>>, vector<12x18xf32>
    %c48_6 = arith.constant 48 : index
    %c18 = arith.constant 18 : index
    %5 = vector.load %arg2[%c48_6, %c18] : memref<64x32xf32, #tpu.memory_space<vmem>>, vector<12x1xf32>
    %c48_7 = arith.constant 48 : index
    %c19 = arith.constant 19 : index
    %6 = vector.load %arg2[%c48_7, %c19] : memref<64x32xf32, #tpu.memory_space<vmem>>, vector<12x1xf32>
    %c48_8 = arith.constant 48 : index
    %c20 = arith.constant 20 : index
    %7 = vector.load %arg2[%c48_8, %c20] : memref<64x32xf32, #tpu.memory_space<vmem>>, vector<1x1xf32>
    %c0_i32 = arith.constant 0 : i32
    %c512_i32 = arith.constant 512 : i32
    %8 = arith.muli %c0_i32, %c512_i32 : i32
    %9 = tpu.assume_multiple %8, 512 : i32
    %c0_9 = arith.constant 0 : index
    %10 = arith.index_cast %9 : i32 to index
    %11 = vector.load %arg1[%c0_9, %10] : memref<6x512xf32, #tpu.memory_space<vmem>>, vector<6x512xf32>
    %cst = arith.constant dense<0.000000e+00> : vector<24x512xf32>
    %12 = tpu.matmul %0, %11, %cst {dimension_numbers = #tpu.dot_dimension_numbers<[1], [0], [0], [1], [0, 0, 1, 1], [], []>} : vector<24x6xf32>, vector<6x512xf32>, vector<24x512xf32> -> vector<24x512xf32>
    %13 = vector.broadcast %1 : vector<24x1xf32> to vector<24x512xf32>
    %14 = arith.addf %12, %13 : vector<24x512xf32>
    %15 = math.tanh %14 : vector<24x512xf32>
    %cst_10 = arith.constant dense<0.000000e+00> : vector<18x512xf32>
    %16 = tpu.matmul %2, %15, %cst_10 {dimension_numbers = #tpu.dot_dimension_numbers<[1], [0], [0], [1], [0, 0, 1, 1], [], []>} : vector<18x24xf32>, vector<24x512xf32>, vector<18x512xf32> -> vector<18x512xf32>
    %17 = vector.broadcast %3 : vector<18x1xf32> to vector<18x512xf32>
    %18 = arith.addf %16, %17 : vector<18x512xf32>
    %19 = math.tanh %18 : vector<18x512xf32>
    %cst_11 = arith.constant dense<0.000000e+00> : vector<12x512xf32>
    %20 = tpu.matmul %4, %19, %cst_11 {dimension_numbers = #tpu.dot_dimension_numbers<[1], [0], [0], [1], [0, 0, 1, 1], [], []>} : vector<12x18xf32>, vector<18x512xf32>, vector<12x512xf32> -> vector<12x512xf32>
    %21 = vector.broadcast %5 : vector<12x1xf32> to vector<12x512xf32>
    %22 = arith.addf %20, %21 : vector<12x512xf32>
    %cst_12 = arith.constant 0.000000e+00 : f32
    %23 = vector.broadcast %cst_12 : f32 to vector<12x512xf32>
    %24 = arith.maximumf %22, %23 : vector<12x512xf32>
    %25 = vector.broadcast %6 : vector<12x1xf32> to vector<12x512xf32>
    %26 = arith.mulf %24, %25 : vector<12x512xf32>
    %cst_13 = arith.constant dense<0.000000e+00> : vector<512xf32>
    %27 = vector.multi_reduction <add>, %26, %cst_13 [0] : vector<12x512xf32> to vector<512xf32>
    %28 = vector.shape_cast %27 : vector<512xf32> to vector<1x512xf32>
    %29 = vector.broadcast %7 : vector<1x1xf32> to vector<1x512xf32>
    %30 = arith.addf %28, %29 : vector<1x512xf32>
    %c0_14 = arith.constant 0 : index
    %31 = arith.index_cast %9 : i32 to index
    %32 = vector.load %arg3[%c0_14, %31] : memref<1x512xf32, #tpu.memory_space<vmem>>, vector<1x512xf32>
    tpu.vector_store %arg3[%c0_14, %31], %30 {strides = array<i32>} : memref<1x512xf32, #tpu.memory_space<vmem>>, vector<1x512xf32>,
    %c1_i32 = arith.constant 1 : i32
    return
  }
  func.func @transform_0(%arg0: i32) -> (i32, i32) {
    %c0_i32 = arith.constant 0 : i32
    %c0_i32_0 = arith.constant 0 : i32
    return %c0_i32, %arg0 : i32, i32
  }
  func.func @transform_1(%arg0: i32) -> (i32, i32) {
    %c0_i32 = arith.constant 0 : i32
    %c0_i32_0 = arith.constant 0 : i32
    %c0_i32_1 = arith.constant 0 : i32
    return %c0_i32, %c0_i32_0 : i32, i32
  }
  func.func @transform_2(%arg0: i32) -> (i32, i32) {
    %c0_i32 = arith.constant 0 : i32
    %c0_i32_0 = arith.constant 0 : i32
    return %c0_i32, %arg0 : i32, i32
  }
}

</mosaic_0001>

<bundles_post_ra>
// kernel: tpu_custom_call.1
= control target key start
LH: loop header
LB: loop body
LE: loop exit
PB: predicated region body
PF: predicated region fallthrough
CT: control target
= control target key end

     0   :  { %vm47_vm0 = vcmask 1045504   ;;  %vm40_vm1 = vcmask 48128   ;;  %v862_v5 = vmov 0.0   ;;  %s985_s0 = inlined_call_operand.vmem [shape: f32[6,512], index: 0, kind: input, shape index: {}]   ;;  %s986_s1 = inlined_call_operand.vmem [shape: f32[64,32], index: 1, kind: input, shape index: {}]   ;;  %s987_s2 = inlined_call_operand.hbm [shape: f32[1,512], index: 2, kind: output, shape index: {}]  }
   0x1   :  { %v22_v0 = vld [vmem:[%s985_s0 + $0x8] sm:$0x3f]  ;;  %v24_v1 = vld [vmem:[%s985_s0 + $0x18] sm:$0x3f]  ;;  %v21_v2 = vld [vmem:[%s985_s0] sm:$0x3f]  ;;  %124 = vmatprep.mubr.f32.mxu0 %v862_v5 }
   0x2   :  { %734 = vmatprep.subr.msk.mxu0 %vm47_vm0, %v22_v0  ;;  %739 = vmatprep.subr.msk.mxu1 %vm47_vm0, %v24_v1  ;;  %v23_v3 = vld [vmem:[%s985_s0 + $0x10] sm:$0x3f]  ;;  %v12_v4 = vld [vmem:[%s986_s1] sm:$0xff] }
   0x3   :  { %735 = vmatpush1.msk.msra.mxu0 %vm47_vm0, %v21_v2 }
   0x4   :  { %7 = vsyncpa [#allocation3], 0  ;;  %740 = vmatpush1.msk.msra.mxu1 %vm47_vm0, %v23_v3  ;;  %207 = vmatprep.mubr.f32.mxu1 %v862_v5  ;;  %v13_v6 = vld [vmem:[%s986_s1 + $0x8] sm:$0xff]  ;;  %v14_v7 = vld [vmem:[%s986_s1 + $0x10] sm:$0xff]  ;;  %v863_v8 = vmov 6   ;;  %v864_v11 = vmov 24  }
   0x5   :  { %736 = vmatmul.mubr.msk.f32.vlgmr.msra.gmra.mrb[0].mxu0 %vm40_vm1, %v12_v4  ;;  %741 = vmatmul.mubr.msk.f32.vlgmr.msra.gmra.mrb[0].mxu1 %vm40_vm1, %v12_v4  ;;  %v923_v9 = vld [vmem:[%s986_s1 + $0x18] sm:$0xff]  ;;  %v928_v10 = vld [vmem:[%s986_s1 + $0x20] sm:$0xff]  ;;  %v935_v12 = vld [vmem:[%s986_s1 + $0x28] sm:$0x3]  ;;  %vm253_vm2 = vcmask 195584   ;;  %v865_v58 = vmov 18  }
   0x6   :  { %130 = vmatprep.mubr.f32.mxu0 %v862_v5  ;;  %213 = vmatprep.mubr.f32.mxu1 %v862_v5  ;;  %v953_v56 = vld [vmem:[%s986_s1 + $0x30] sm:$0xff]  ;;  %v958_v57 = vld [vmem:[%s986_s1 + $0x38] sm:$0xf]  ;;  %v866_v60 = vmov 19   ;;  %v867_v61 = vmov 20   ;;  %vm453_vm3 = vcmask 1041408  }
   0x7   :  { %782 = vset.pattern.permute.xlu0 %v863_v8  ;;  %783 = vset.pattern.permute.xlu1 %v863_v8  ;;  %v20_v59 = vld [vmem:[%s986_s1 + $0x30] sm:$0x1]  ;;  %vm448_vm4 = vcmask 146432   ;;  %vm644_vm5 = vcmask 1043456   ;;  %s869_s1 = smov [#allocation2]  }
   0x8   :  { %27 = vperm.xlu0 %782, %v12_v4   ;;  %37 = vperm.xlu1 %783, %v14_v7   ;;  %s726_s6 = sshll.u32 %s869_s1, 4  ;;  %s727_s6 = int_to_ptr.vmem [resolvable:$true] %s726_s6 }
   0x9   :  { %737 = vmatmul.mubr.msk.f32.gmra.mrb[2].mxu0 %vm40_vm1, %v13_v6  ;;  %742 = vmatmul.mubr.msk.f32.gmra.mrb[2].mxu1 %vm40_vm1, %v13_v6  ;;  %s838_s7 = scalar_lea.vmem %s727_s6, 64  ;;  %p843_p1 = scmp.lt.s32.totalorder %s727_s6, %s727_s6 }
   0xa   :  { %136 = vmatprep.mubr.f32.mxu0 %v862_v5  ;;  %219 = vmatprep.mubr.f32.mxu1 %v862_v5  ;;  %p839_p0 = scmp.ne.s32.totalorder %s727_s6, %s838_s7  ;;  %p844_p2 = scmp.lt.s32.totalorder %s838_s7, %s838_s7 }
   0xc   :  { %32 = vperm.xlu0 %782, %v13_v6   ;;  %784 = vset.pattern.permute.xlu1 %v864_v11  ;;  %p845_p3 = por %p844_p2, %p843_p1 }
   0xd   :  { %738 = vmatmul.mubr.msk.f32.gmra.mrb[4].mxu0 %vm40_vm1, %v14_v7  ;;  %743 = vmatmul.mubr.msk.f32.gmra.mrb[4].mxu1 %vm40_vm1, %v14_v7 }
   0xe   :  { %324 = vmatprep.mubr.f32.mxu0 %v862_v5  ;;  %407 = vmatprep.mubr.f32.mxu1 %v862_v5  ;;  %p846_p4 = pnand %p845_p3, %p839_p0 }
   0xf   :  { %240 = vperm.xlu1 %784, %v923_v9  }
  0x10   :  { %785 = vset.pattern.permute.xlu0 %v864_v11 }
  0x11   :  { %245 = vperm.xlu0 %785, %v928_v10  }
  0x13   :  { %250 = vperm.xlu1 %784, %v935_v12  }
  0x15   :  { %787 = vset.pattern.permute.xlu0 %v865_v58 }
  0x16   :  { %440 = vperm.xlu0 %787, %v953_v56  }
  0x17   :  { %786 = vset.pattern.permute.xlu1 %v865_v58 }
  0x18   :  { %445 = vperm.xlu1 %786, %v958_v57  }
  0x1a   :  { %789 = vset.pattern.permute.xlu0 %v867_v61 }
  0x1b   :  { %679 = vperm.xlu0 %789, %v20_v59  }
  0x1c   :  { %788 = vset.pattern.permute.xlu1 %v866_v60 }
  0x1d   :  { %633 = vperm.xlu1 %788, %v958_v57  }
  0x21   :  { %629 = vperm.xlu1 %788, %v953_v56  }
  0x87   :  { %v28_v13 = vpop.permute.xlu0 %27  ;;  %v38_v31 = vpop.permute.xlu1 %37 }
  0x8b   :  { %v33_v22 = vpop.permute.xlu0 %32 }
  0x8e   :  { %v241_v62 = vpop.permute.xlu1 %240 }
  0x90   :  { %v246_v7 = vpop.permute.xlu0 %245 }
  0xd8   :  { %v126_v14 = vpop.f32.mrb[0].mxu0  ;;  %v209_v15 = vpop.f32.mrb[0].mxu1 }
  0xd9   :  { %v127_v16 = vadd.f32 %v126_v14, %v28_v13  ;;  %v210_v17 = vadd.f32 %v209_v15, %v28_v13  ;;  %v128_v18 = vpop.f32.mrb[1].mxu0  ;;  %v211_v19 = vpop.f32.mrb[1].mxu1 }
  0xda   :  { %v129_v20 = vadd.f32 %v128_v18, %v28_v13  ;;  %v212_v21 = vadd.f32 %v211_v19, %v28_v13 }
  0xdb   :  { %790 = vtanh.f32 %v127_v16 }
  0xdc   :  { %792 = vtanh.f32 %v210_v17  ;;  %v132_v23 = vpop.f32.mrb[2].mxu0  ;;  %v215_v24 = vpop.f32.mrb[2].mxu1 }
  0xdd   :  { %794 = vtanh.f32 %v129_v20  ;;  %v133_v25 = vadd.f32 %v132_v23, %v33_v22  ;;  %v216_v26 = vadd.f32 %v215_v24, %v33_v22  ;;  %v134_v27 = vpop.f32.mrb[3].mxu0  ;;  %v217_v28 = vpop.f32.mrb[3].mxu1 }
  0xde   :  { %796 = vtanh.f32 %v212_v21  ;;  %v135_v29 = vadd.f32 %v134_v27, %v33_v22  ;;  %v218_v30 = vadd.f32 %v217_v28, %v33_v22  ;;  %v251_v17 = vpop.permute.xlu1 %250 }
  0xdf   :  { %798 = vtanh.f32 %v133_v25 }
  0xe0   :  { %800 = vtanh.f32 %v216_v26  ;;  %v138_v32 = vpop.f32.mrb[4].mxu0  ;;  %v221_v33 = vpop.f32.mrb[4].mxu1 }
  0xe1   :  { %802 = vtanh.f32 %v135_v29  ;;  %v140_v34 = vpop.f32.mrb[5].mxu0  ;;  %v223_v35 = vpop.f32.mrb[5].mxu1  ;;  %v139_v38 = vadd.f32 %v138_v32, %v38_v31  ;;  %v222_v40 = vadd.f32 %v221_v33, %v38_v31 }
  0xe2   :  { %804 = vtanh.f32 %v218_v30  ;;  %v141_v36 = vadd.f32 %v140_v34, %v38_v31  ;;  %v224_v37 = vadd.f32 %v223_v35, %v38_v31 }
  0xe4   :  { %806 = vtanh.f32 %v141_v36 }
  0xe5   :  { %v791_v39 = vpop.eup %790  ;;  %808 = vtanh.f32 %v224_v37 }
  0xe6   :  { %v793_v41 = vpop.eup %792  ;;  %810 = vtanh.f32 %v139_v38 }
  0xe7   :  { %v795_v42 = vpop.eup %794  ;;  %812 = vtanh.f32 %v222_v40 }
  0xe8   :  { %v797_v43 = vpop.eup %796 }
  0xe9   :  { %v799_v44 = vpop.eup %798 }
  0xea   :  { %v801_v45 = vpop.eup %800  ;;  %v760_v46 = vpack.c.bf16 %v799_v44, %v791_v39 }
  0xeb   :  { %v803_v47 = vpop.eup %802  ;;  %v764_v48 = vpack.c.bf16 %v801_v45, %v793_v41 }
  0xec   :  { %v805_v49 = vpop.eup %804  ;;  %v758_v50 = vpack.c.bf16 %v803_v47, %v795_v42  ;;  %v446_v42 = vpop.permute.xlu1 %445 }
  0xed   :  { %v762_v51 = vpack.c.bf16 %v805_v49, %v797_v43  ;;  %v441_v43 = vpop.permute.xlu0 %440 }
  0xee   :  { %759 = vmatprep.subr.bf16.mxu0 %v758_v50  ;;  %v807_v52 = vpop.eup %806 }
  0xef   :  { %763 = vmatprep.subr.bf16.mxu1 %v762_v51  ;;  %761 = vmatpush1.bf16.msra.mxu0 %v760_v46  ;;  %v809_v53 = vpop.eup %808 }
  0xf0   :  { %765 = vmatpush1.bf16.msra.mxu1 %v764_v48  ;;  %264 = vmatprep.subr.mxu0 %v807_v52  ;;  %v811_v54 = vpop.eup %810  ;;  %v634_v45 = vpop.permute.xlu1 %633 }
  0xf1   :  { %347 = vmatprep.subr.mxu1 %v809_v53  ;;  %v813_v55 = vpop.eup %812 }
  0xf3   :  { %265 = vmatpush1.msra.mxu0 %v811_v54 }
  0xf4   :  { %348 = vmatpush1.msra.mxu1 %v813_v55  ;;  %744 = vmatmul.mubr.msk.f32.vlgmr.msra.gmra.mrb[6].mxu0 %vm253_vm2, %v923_v9 }
  0xf5   :  { %747 = vmatmul.mubr.msk.f32.vlgmr.msra.gmra.mrb[6].mxu1 %vm253_vm2, %v923_v9  ;;  %330 = vmatprep.mubr.f32.mxu0 %v862_v5 }
  0xf6   :  { %413 = vmatprep.mubr.f32.mxu1 %v862_v5 }
  0xf8   :  { %745 = vmatmul.mubr.msk.f32.gmra.mrb[8].mxu0 %vm253_vm2, %v928_v10 }
  0xf9   :  { %748 = vmatmul.mubr.msk.f32.gmra.mrb[8].mxu1 %vm253_vm2, %v928_v10  ;;  %336 = vmatprep.mubr.f32.mxu0 %v862_v5 }
  0xfa   :  { %419 = vmatprep.mubr.f32.mxu1 %v862_v5 }
  0xfc   :  { %746 = vmatmul.mubr.msk.f32.gmra.mrb[10].mxu0 %vm253_vm2, %v935_v12 }
  0xfd   :  { %749 = vmatmul.mubr.msk.f32.gmra.mrb[10].mxu1 %vm253_vm2, %v935_v12  ;;  %530 = vmatprep.mubr.f32.mxu0 %v862_v5 }
  0xfe   :  { %607 = vmatprep.mubr.f32.mxu1 %v862_v5 }
 0x1c7   :  { %v326_v63 = vpop.f32.mrb[6].mxu0 }
 0x1c8   :  { %v327_v0 = vadd.f32 %v326_v63, %v241_v62  ;;  %v409_v1 = vpop.f32.mrb[6].mxu1  ;;  %v328_v2 = vpop.f32.mrb[7].mxu0 }
 0x1c9   :  { %v410_v3 = vadd.f32 %v409_v1, %v241_v62  ;;  %v329_v4 = vadd.f32 %v328_v2, %v241_v62  ;;  %v411_v6 = vpop.f32.mrb[7].mxu1 }
 0x1ca   :  { %814 = vtanh.f32 %v327_v0  ;;  %v412_v8 = vadd.f32 %v411_v6, %v241_v62  ;;  %v630_v62 = vpop.permute.xlu1 %629 }
 0x1cb   :  { %816 = vtanh.f32 %v410_v3  ;;  %v332_v9 = vpop.f32.mrb[8].mxu0 }
 0x1cc   :  { %818 = vtanh.f32 %v329_v4  ;;  %v333_v10 = vadd.f32 %v332_v9, %v246_v7  ;;  %v415_v11 = vpop.f32.mrb[8].mxu1  ;;  %v334_v12 = vpop.f32.mrb[9].mxu0 }
 0x1cd   :  { %820 = vtanh.f32 %v412_v8  ;;  %v416_v13 = vadd.f32 %v415_v11, %v246_v7  ;;  %v335_v14 = vadd.f32 %v334_v12, %v246_v7  ;;  %v417_v15 = vpop.f32.mrb[9].mxu1 }
 0x1ce   :  { %822 = vtanh.f32 %v333_v10  ;;  %v418_v16 = vadd.f32 %v417_v15, %v246_v7 }
 0x1cf   :  { %824 = vtanh.f32 %v416_v13  ;;  %v338_v18 = vpop.f32.mrb[10].mxu0 }
 0x1d0   :  { %826 = vtanh.f32 %v335_v14  ;;  %v421_v19 = vpop.f32.mrb[10].mxu1  ;;  %v340_v20 = vpop.f32.mrb[11].mxu0  ;;  %v339_v24 = vadd.f32 %v338_v18, %v251_v17 }
 0x1d1   :  { %828 = vtanh.f32 %v418_v16  ;;  %v341_v21 = vadd.f32 %v340_v20, %v251_v17  ;;  %v423_v22 = vpop.f32.mrb[11].mxu1  ;;  %v422_v26 = vadd.f32 %v421_v19, %v251_v17 }
 0x1d2   :  { %v424_v23 = vadd.f32 %v423_v22, %v251_v17 }
 0x1d3   :  { %830 = vtanh.f32 %v341_v21 }
 0x1d4   :  { %v815_v25 = vpop.eup %814  ;;  %832 = vtanh.f32 %v424_v23 }
 0x1d5   :  { %v817_v27 = vpop.eup %816  ;;  %834 = vtanh.f32 %v339_v24 }
 0x1d6   :  { %v819_v28 = vpop.eup %818  ;;  %836 = vtanh.f32 %v422_v26 }
 0x1d7   :  { %v821_v29 = vpop.eup %820 }
 0x1d8   :  { %v823_v30 = vpop.eup %822 }
 0x1d9   :  { %v825_v31 = vpop.eup %824  ;;  %v768_v32 = vpack.c.bf16 %v823_v30, %v815_v25 }
 0x1da   :  { %v827_v33 = vpop.eup %826  ;;  %v772_v34 = vpack.c.bf16 %v825_v31, %v817_v27 }
 0x1db   :  { %v829_v35 = vpop.eup %828  ;;  %v766_v36 = vpack.c.bf16 %v827_v33, %v819_v28  ;;  %v868_v33 = vmov 1966171168  }
 0x1dc   :  { %v770_v37 = vpack.c.bf16 %v829_v35, %v821_v29  ;;  %v695_v35 = vlaneseq }
 0x1dd   :  { %767 = vmatprep.subr.bf16.mxu0 %v766_v36  ;;  %v831_v38 = vpop.eup %830 }
 0x1de   :  { %771 = vmatprep.subr.bf16.mxu1 %v770_v37  ;;  %769 = vmatpush1.bf16.msra.mxu0 %v768_v32  ;;  %v833_v39 = vpop.eup %832  ;;  %vm717_vm6 = vcmp.lt.s32.totalorder %v695_v35, 512 }
 0x1df   :  { %773 = vmatpush1.bf16.msra.mxu1 %v772_v34  ;;  %750 = vmatprep.subr.msk.mxu0 %vm453_vm3, %v831_v38  ;;  %v835_v40 = vpop.eup %834  ;;  %v693_v34 = vunpack.c.l.s4 %v868_v33 }
 0x1e0   :  { %754 = vmatprep.subr.msk.mxu1 %vm453_vm3, %v833_v39  ;;  %v837_v41 = vpop.eup %836 }
 0x1e2   :  { %751 = vmatpush1.msk.msra.mxu0 %vm453_vm3, %v835_v40 }
 0x1e3   :  { %755 = vmatpush1.msk.msra.mxu1 %vm453_vm3, %v837_v41  ;;  %752 = vmatmul.mubr.msk.f32.vlgmr.msra.gmra.mrb[12].mxu0 %vm448_vm4, %v953_v56 }
 0x1e4   :  { %756 = vmatmul.mubr.msk.f32.vlgmr.msra.gmra.mrb[12].mxu1 %vm448_vm4, %v953_v56  ;;  %536 = vmatprep.mubr.f32.mxu0 %v862_v5 }
 0x1e5   :  { %613 = vmatprep.mubr.f32.mxu1 %v862_v5 }
 0x1e7   :  { %753 = vmatmul.mubr.msk.f32.gmra.mrb[14].mxu0 %vm448_vm4, %v958_v57 }
 0x1e8   :  { %757 = vmatmul.mubr.msk.f32.gmra.mrb[14].mxu1 %vm448_vm4, %v958_v57 }
 0x2b6   :  { %v532_v44 = vpop.f32.mrb[12].mxu0 }
 0x2b7   :  { %v609_v46 = vpop.f32.mrb[12].mxu1  ;;  %v534_v47 = vpop.f32.mrb[13].mxu0  ;;  %v533_v49 = vadd.f32 %v532_v44, %v441_v43 }
 0x2b8   :  { %v611_v48 = vpop.f32.mrb[13].mxu1  ;;  %v535_v50 = vadd.f32 %v534_v47, %v441_v43  ;;  %v610_v51 = vadd.f32 %v609_v46, %v441_v43  ;;  %v696_v46 = vshrl.u32 %v695_v35, 7 }
 0x2b9   :  { %v612_v53 = vadd.f32 %v611_v48, %v441_v43  ;;  %v620_v60 = vmax.f32 %v533_v49, 0.0 }
 0x2ba   :  { %v538_v52 = vpop.f32.mrb[14].mxu0  ;;  %v621_v63 = vmax.f32 %v535_v50, 0.0  ;;  %v622_v0 = vmax.f32 %v610_v51, 0.0 }
 0x2bb   :  { %v539_v54 = vadd.f32 %v538_v52, %v446_v42  ;;  %v615_v55 = vpop.f32.mrb[14].mxu1  ;;  %v540_v56 = vpop.f32.mrb[15].mxu0  ;;  %v623_v3 = vmax.f32 %v612_v53, 0.0  ;;  %v636_v9 = vmul.f32 %v630_v62, %v620_v60 }
 0x2bc   :  { %v616_v5 = vadd.f32 %v615_v55, %v446_v42  ;;  %v541_v58 = vadd.f32 %v540_v56, %v446_v42  ;;  %v617_v59 = vpop.f32.mrb[15].mxu1  ;;  %v637_v11 = vmul.f32 %v630_v62, %v621_v63  ;;  %v638_v12 = vmul.f32 %v630_v62, %v622_v0 }
 0x2bd   :  { %v624_v57 = vmax.f32 %v539_v54, 0.0  ;;  %v618_v61 = vadd.f32 %v617_v59, %v446_v42  ;;  %v639_v15 = vmul.f32 %v630_v62, %v623_v3  ;;  %v680_v42 = vpop.permute.xlu0 %679 }
 0x2be   :  { %v626_v1 = vmax.f32 %v616_v5, 0.0  ;;  %v625_v2 = vmax.f32 %v541_v58, 0.0 }
 0x2bf   :  { %v640_v4 = vmul.f32 %v634_v45, %v624_v57  ;;  %v627_v6 = vmax.f32 %v618_v61, 0.0 }
 0x2c0   :  { %v642_v7 = vmul.f32 %v634_v45, %v626_v1  ;;  %v641_v8 = vmul.f32 %v634_v45, %v625_v2 }
 0x2c1   :  { %v643_v10 = vmul.f32 %v634_v45, %v627_v6  ;;  %v645_v13 = vsel %vm644_vm5, %v640_v4, 0.0  ;;  %v694_v45 = vunpack.c.0.s8 %v693_v34 }
 0x2c2   :  { %v653_v14 = vsel %vm644_vm5, %v641_v8, 0.0  ;;  %v646_v16 = vadd.f32 %v645_v13, %v636_v9  ;;  %v661_v17 = vsel %vm644_vm5, %v642_v7, 0.0 }
 0x2c3   :  { %v669_v18 = vsel %vm644_vm5, %v643_v10, 0.0  ;;  %v654_v19 = vadd.f32 %v653_v14, %v637_v11  ;;  %v662_v20 = vadd.f32 %v661_v17, %v638_v12  ;;  %v697_v55 = vsub.s32 %v694_v45, %v696_v46 }
 0x2c4   :  { %v647_v21 = vrot.slane %v646_v16, 4  ;;  %v670_v22 = vadd.f32 %v669_v18, %v639_v15 }
 0x2c5   :  { %v655_v23 = vrot.slane %v654_v19, 4  ;;  %v663_v24 = vrot.slane %v662_v20, 4 }
 0x2c6   :  { %v648_v25 = vadd.f32 %v647_v21, %v646_v16  ;;  %v671_v26 = vrot.slane %v670_v22, 4 }
 0x2c7   :  { %v656_v27 = vadd.f32 %v655_v23, %v654_v19  ;;  %v664_v28 = vadd.f32 %v663_v24, %v662_v20 }
 0x2c8   :  { %v672_v29 = vadd.f32 %v671_v26, %v670_v22  ;;  %v649_v30 = vrot.slane %v648_v25, 2 }
 0x2c9   :  { %v657_v31 = vrot.slane %v656_v27, 2  ;;  %v665_v32 = vrot.slane %v664_v28, 2 }
 0x2ca   :  { %v650_v36 = vadd.f32 %v649_v30, %v648_v25  ;;  %v673_v37 = vrot.slane %v672_v29, 2 }
 0x2cb   :  { %v658_v38 = vadd.f32 %v657_v31, %v656_v27  ;;  %v666_v39 = vadd.f32 %v665_v32, %v664_v28 }
 0x2cc   :  { %v651_v40 = vrot.slane %v650_v36, 1  ;;  %v674_v41 = vadd.f32 %v673_v37, %v672_v29 }
 0x2cd   :  { %v659_v43 = vrot.slane %v658_v38, 1  ;;  %v667_v44 = vrot.slane %v666_v39, 1 }
 0x2ce   :  { %v652_v47 = vadd.f32 %v651_v40, %v650_v36  ;;  %v675_v48 = vrot.slane %v674_v41, 1 }
 0x2cf   :  { %v660_v49 = vadd.f32 %v659_v43, %v658_v38  ;;  %v668_v50 = vadd.f32 %v667_v44, %v666_v39 }
 0x2d0   :  { %v676_v51 = vadd.f32 %v675_v48, %v674_v41  ;;  %v682_v52 = vadd.f32 %v680_v42, %v652_v47 }
 0x2d1   :  { %v683_v53 = vadd.f32 %v680_v42, %v660_v49  ;;  %v684_v54 = vadd.f32 %v680_v42, %v668_v50 }
 0x2d2   :  { %v685_v56 = vadd.f32 %v680_v42, %v676_v51 }
 0x2d3   :  { %v690_v5 = vcombine.low %v682_v52, %v683_v53 }
 0x2d4   :  { %v691_v58 = vcombine.low %v684_v54, %v685_v56 }
 0x2d5   :  { %v698_v59 = vrot.slane %v690_v5, %v697_v55 }
 0x2d6   :  { %v705_v60 = vrot.slane %v691_v58, %v697_v55 }
 0x2d8   :  { %v706_v57 = vcombine.low %v698_v59, %v705_v60 }
 0x2da   :  { %v713_v61 = vrot.slane %v706_v57, %v697_v55 }
 0x2dc   :  { %719 = vst.msk [vmem:[#allocation2] sm:$0xf] %vm717_vm6, %v713_v61 }
 0x2dd   :  { %849 = shalt.err (!%p846_p4)
}
 0x2de   :  { %s850_s10 = scalar_lea.hbm %s987_s2, 64 }
 0x2df   :  { %p851_p5 = scmp.ne.s32.totalorder %s987_s2, %s850_s10  ;;  %p854_p6 = scmp.lt.u32.totalorder %s850_s10, %s987_s2 }
 0x2e1   :  { %p856_p7 = pnand %p854_p6, %p851_p5 }
 0x2e3   :  { %859 = shalt.err (!%p856_p7)
}
 0x2e4   :  { %729 = dma.vmem_to_hbm [thread:$0]  %s727_s6, 64, %s987_s2, [#allocation3]  }
 0x2e5   :  { %860 = dma.done.wait [#allocation3], 64  }
 0x2e6   :  { %861 = vsyncadd [#allocation3], 4294967232 }
 0x2e7   :  { %733 = vsyncpa [#allocation3], 1 }

</bundles_post_ra>
